<compile_context>
chip_gen: v7x
topology: tpu7x:2x2x1
jax: 0.10.0
libtpu: 0.0.40
codegen_flags: <defaults>
</compile_context>

<pallas_src>
import math

import jax
import jax.numpy as jnp
from jax.experimental import pallas as pl
from jax.experimental.pallas import tpu as pltpu


def _weight_layer_kernel(x_ref, w_ref, o_ref):
    # x_ref: (TM, Dp) streamed, w_ref: (Dp, P) resident, o_ref: (TM, P)
    o_ref[...] = jnp.dot(
        x_ref[...], w_ref[...], preferred_element_type=jnp.float32
    ).astype(o_ref.dtype)


def _round_up(a, b):
    return ((a + b - 1) // b) * b


def _choose_pack(m, d):
    """Rows packed per lane-row.  p*d is a multiple of 128 (lane-dense) and
    p divides m, so packing is a free reshape (no pad / copy of x)."""
    if m == 0 or d % 128 == 0:
        return 1
    base = 128 // math.gcd(d, 128)           # smallest lane-dense packing
    if m % base != 0 or base * d > 8192:
        return 1                              # zero-copy fallback: no packing
    p = base
    # Grow p (lane-denser output stores) while packed rows stay plentiful and
    # the packed row stays <= 4096 lanes.
    while (2 * p * d) <= 4096 and m % (2 * p) == 0 and (m // (2 * p)) >= 1024:
        p *= 2
    return p


def _pack_weight(kernel, p):
    """Block-diagonal (p*d, p) weight: w[i*d + j, i] = kernel[j, 0].
    In a real model, hoist/cache this per (kernel, p) so it is not rebuilt
    every forward (it is at most ~2 MiB)."""
    d = kernel.shape[0]
    if p == 1:
        return kernel
    eye = jnp.eye(p, dtype=kernel.dtype)                       # (p, p)
    return (eye[:, None, :] * kernel.reshape(1, d, 1)).reshape(p * d, p)


def _vmem_limit_bytes():
    try:
        cap = int(pltpu.get_tpu_info().vmem_capacity_bytes)    # 64 MiB/TC v7x, 128 MiB v5e/v6e
    except Exception:
        cap = 64 * 1024 * 1024                                  # conservative default
    # ~48 MiB on v7x, ~96 MiB on v5e/v6e.
    return max(32 * 1024 * 1024, min((3 * cap) // 4, 96 * 1024 * 1024))


def weight_layer_forward(x, kernel, *, tm_cap=32768, min_steps=8, min_tile_rows=512):
    """y = squeeze(x @ kernel, -1).  x: (..., D), kernel: (D, 1) -> (...)."""
    *lead, d = x.shape
    assert kernel.shape == (d, 1)
    m = math.prod(lead) if lead else 1
    out_dtype = jnp.promote_types(x.dtype, kernel.dtype)

    p = _choose_pack(m, d)
    dp = p * d
    mp = m // p                                   # exact: p divides m
    x_packed = x.reshape(mp, dp)                  # free (contiguous row-major)
    w_packed = _pack_weight(kernel, p)

    xi = jnp.dtype(x.dtype).itemsize
    oi = jnp.dtype(out_dtype).itemsize
    wi = jnp.dtype(kernel.dtype).itemsize
    sub = max(8, 32 // xi)                        # sublane quantum: 8 f32 / 16 bf16 / 32 int8

    # --- Row-tile sizing from a per-generation VMEM budget -------------------
    vmem_limit = _vmem_limit_bytes()
    fixed = 2 * dp * p * wi                                   # resident (buffered) weight
    per_row = 2 * dp * xi + 2 * 128 * oi                      # dbl-buffered x row + lane-padded out row
    avail = max(per_row * sub, vmem_limit // 2 - fixed)       # keep ~half the limit as headroom
    tm = max(sub, (avail // per_row) // sub * sub)
    tm = min(tm, tm_cap)
    # Keep >= min_steps grid iterations (pipelining + v7x 2-TC sharding), but
    # never shrink the streamed tile below min_tile_rows rows.
    if mp >= 2 * max(min_tile_rows, sub):
        tm = min(tm, max(min_tile_rows, _round_up(pl.cdiv(mp, min_steps), sub)))
    if tm >= mp:
        tm = mp                                   # single full-extent block
    else:
        tm = max(sub, (tm // sub) * sub)          # sublane-aligned partial block

    grid = (pl.cdiv(mp, tm),)                     # ragged last tile: Pallas masks it

    out = pl.pallas_call(
        _weight_layer_kernel,
        out_shape=jax.ShapeDtypeStruct((mp, p), out_dtype),
        grid_spec=pl.GridSpec(
            grid=grid,
            in_specs=[
                pl.BlockSpec((tm, dp), lambda i: (i, 0)),     # streamed x tiles
                pl.BlockSpec((dp, p), lambda i: (0, 0)),      # weight stays resident
            ],
            out_specs=pl.BlockSpec((tm, p), lambda i: (i, 0)),
        ),
        compiler_params=pltpu.CompilerParams(
            dimension_semantics=("parallel",),                # megacore on v7x; harmless elsewhere
            vmem_limit_bytes=vmem_limit,
        ),
        cost_estimate=pl.CostEstimate(
            flops=2 * mp * dp * p,
            transcendentals=0,
            bytes_accessed=mp * dp * xi + dp * p * wi + mp * p * oi,
        ),
    )(x_packed, w_packed)

    return out.reshape(tuple(lead))


if __name__ == "__main__":
    key = jax.random.PRNGKey(0)
    kx, kw = jax.random.split(key)

    B, T, D = 2, 8, 32                           # input_dim = 32 (TIMNET-style)
    x = jax.random.normal(kx, (B, T, D), dtype=jnp.float32)
    # deterministic stand-in for torch.randn(input_dim, 1)
    w = jax.random.normal(kw, (D, 1), dtype=jnp.float32)

    y = weight_layer_forward(x, w)
    jax.block_until_ready(y)
    y_ref = jnp.squeeze(jnp.matmul(x, w), -1)
    assert y.shape == (B, T)
    assert jnp.allclose(y, y_ref, atol=1e-5, rtol=1e-5)

    # Misaligned row count exercises the zero-copy (p=1) fallback path.
    x2 = jax.random.normal(kx, (5, D), dtype=jnp.float32)
    y2 = weight_layer_forward(x2, w)
    jax.block_until_ready(y2)
    assert y2.shape == (5,)
    assert jnp.allclose(y2, jnp.squeeze(jnp.matmul(x2, w), -1), atol=1e-5, rtol=1e-5)

    print("KERNEL_OK")
</pallas_src>

<mosaic_0001>
module attributes {stable_mosaic.version = 11 : i64} {
  func.func @_weight_layer_kernel(%arg0: i32, %arg1: memref<4x128xf32, #tpu.memory_space<vmem>>, %arg2: memref<128x4xf32, #tpu.memory_space<vmem>>, %arg3: memref<4x4xf32, #tpu.memory_space<vmem>>) attributes {dimension_semantics = [#tpu.dimension_semantics<parallel>], iteration_bounds = array<i64: 1>, scalar_prefetch = 0 : i64, scratch_operands = 0 : i64, tpu.core_type = #tpu.core_type<tc>, window_params = [{transform_indices = @transform_0, window_bounds = array<i64: 4, 128>}, {pipeline_mode = #tpu.pipeline_mode<synchronous>, transform_indices = @transform_1, window_bounds = array<i64: 128, 4>}, {transform_indices = @transform_2, window_bounds = array<i64: 4, 4>}]} {
    %c0 = arith.constant 0 : index
    %c0_0 = arith.constant 0 : index
    %0 = vector.load %arg1[%c0, %c0_0] : memref<4x128xf32, #tpu.memory_space<vmem>>, vector<4x128xf32>
    %c0_1 = arith.constant 0 : index
    %c0_2 = arith.constant 0 : index
    %1 = vector.load %arg2[%c0_1, %c0_2] : memref<128x4xf32, #tpu.memory_space<vmem>>, vector<128x4xf32>
    %cst = arith.constant dense<0.000000e+00> : vector<4x4xf32>
    %2 = tpu.matmul %0, %1, %cst {dimension_numbers = #tpu.dot_dimension_numbers<[1], [0], [0], [1], [0, 0, 1, 1], [], []>} : vector<4x128xf32>, vector<128x4xf32>, vector<4x4xf32> -> vector<4x4xf32>
    %c0_3 = arith.constant 0 : index
    %c0_4 = arith.constant 0 : index
    %3 = vector.load %arg3[%c0_3, %c0_4] : memref<4x4xf32, #tpu.memory_space<vmem>>, vector<4x4xf32>
    tpu.vector_store %arg3[%c0_3, %c0_4], %2 {strides = array<i32>} : memref<4x4xf32, #tpu.memory_space<vmem>>, vector<4x4xf32>,
    return
  }
  func.func @transform_0(%arg0: i32) -> (i32, i32) {
    %c0_i32 = arith.constant 0 : i32
    %c0_i32_0 = arith.constant 0 : i32
    return %arg0, %c0_i32 : i32, i32
  }
  func.func @transform_1(%arg0: i32) -> (i32, i32) {
    %c0_i32 = arith.constant 0 : i32
    %c0_i32_0 = arith.constant 0 : i32
    %c0_i32_1 = arith.constant 0 : i32
    return %c0_i32, %c0_i32_0 : i32, i32
  }
  func.func @transform_2(%arg0: i32) -> (i32, i32) {
    %c0_i32 = arith.constant 0 : i32
    %c0_i32_0 = arith.constant 0 : i32
    return %arg0, %c0_i32 : i32, i32
  }
}

</mosaic_0001>

<bundles_post_ra>
// kernel: tpu_custom_call.1
= control target key start
LH: loop header
LB: loop body
LE: loop exit
PB: predicated region body
PF: predicated region fallthrough
CT: control target
= control target key end

     0   :  { %v219_v3 = vmov 0.0|0.0   ;;  %vm220_vm0 = vmmov 0   ;;  %v221_v6 = vmov 0.0   ;;  %s301_s0 = inlined_call_operand.vmem [shape: f32[4,128], index: 0, kind: input, shape index: {}]   ;;  %s302_s1 = inlined_call_operand.vmem [shape: f32[128,4], index: 1, kind: input, shape index: {}]   ;;  %s303_s2 = inlined_call_operand.hbm [shape: f32[4,4], index: 2, kind: output, shape index: {}]  }
   0x1   :  { %v13_v0 = vld [vmem:[%s302_s1] sm:$0xff]  ;;  %v14_v1 = vld [vmem:[%s302_s1 + $0x8] sm:$0xff]  ;;  %v15_v2 = vld [vmem:[%s302_s1 + $0x10] sm:$0xff]  ;;  %167 = vmatprep.subr.bf16.mxu0 %v219_v3  ;;  %164 = vmatprep.mubr.msk.f32.mxu0 %vm220_vm0, %v221_v6 }
   0x2   :  { %v168_v4 = vpack.c.bf16 %v14_v1, %v13_v0  ;;  %v16_v5 = vld [vmem:[%s302_s1 + $0x18] sm:$0xff]  ;;  %v17_v8 = vld [vmem:[%s302_s1 + $0x20] sm:$0xff]  ;;  %v18_v9 = vld [vmem:[%s302_s1 + $0x28] sm:$0xff] }
   0x3   :  { %v171_v7 = vpack.c.bf16 %v16_v5, %v15_v2 }
   0x4   :  { %169 = vmatpush3.bf16.msra.mxu0 %v168_v4 }
   0x5   :  { %170 = vmatprep.subr.bf16.mxu0 %v219_v3 }
   0x6   :  { %7 = vsyncpa [#allocation3], 0  ;;  %v174_v10 = vpack.c.bf16 %v18_v9, %v17_v8  ;;  %v19_v11 = vld [vmem:[%s302_s1 + $0x30] sm:$0xff]  ;;  %v20_v12 = vld [vmem:[%s302_s1 + $0x38] sm:$0xff]  ;;  %s222_s15 = smov [#allocation2]   ;;  %vm99_vm1 = vcmask 27648  }
   0x7   :  { %v177_v13 = vpack.c.bf16 %v20_v12, %v19_v11  ;;  %v21_v14 = vld [vmem:[%s302_s1 + $0x40] sm:$0xff]  ;;  %v22_v15 = vld [vmem:[%s302_s1 + $0x48] sm:$0xff]  ;;  %v23_v17 = vld [vmem:[%s302_s1 + $0x50] sm:$0xff]  ;;  %s107_s16 = sshll.u32 %s222_s15, 4  ;;  %s108_s16 = int_to_ptr.vmem [resolvable:$true] %s107_s16 }
   0x8   :  { %172 = vmatpush3.bf16.msra.mxu0 %v171_v7  ;;  %v180_v16 = vpack.c.bf16 %v22_v15, %v21_v14  ;;  %v24_v18 = vld [vmem:[%s302_s1 + $0x58] sm:$0xff]  ;;  %v25_v20 = vld [vmem:[%s302_s1 + $0x60] sm:$0xff]  ;;  %v26_v21 = vld [vmem:[%s302_s1 + $0x68] sm:$0xff]  ;;  %s195_s17 = scalar_lea.vmem %s108_s16, 64  ;;  %p200_p1 = scmp.lt.s32.totalorder %s108_s16, %s108_s16 }
   0x9   :  { %173 = vmatprep.subr.bf16.mxu0 %v219_v3  ;;  %v183_v19 = vpack.c.bf16 %v24_v18, %v23_v17  ;;  %v186_v22 = vpack.c.bf16 %v26_v21, %v25_v20  ;;  %v27_v23 = vld [vmem:[%s302_s1 + $0x70] sm:$0xff]  ;;  %v28_v24 = vld [vmem:[%s302_s1 + $0x78] sm:$0xff]  ;;  %v12_v26 = vld [vmem:[%s301_s0] sm:$0xf]  ;;  %p196_p0 = scmp.ne.s32.totalorder %s108_s16, %s195_s17  ;;  %p201_p2 = scmp.lt.s32.totalorder %s195_s17, %s195_s17 }
   0xa   :  { %v189_v25 = vpack.c.bf16 %v28_v24, %v27_v23 }
   0xb   :  { %p202_p3 = por %p201_p2, %p200_p1 }
   0xc   :  { %175 = vmatpush3.bf16.msra.mxu0 %v174_v10 }
   0xd   :  { %176 = vmatprep.subr.bf16.mxu0 %v219_v3  ;;  %p203_p4 = pnand %p202_p3, %p196_p0 }
  0x10   :  { %178 = vmatpush3.bf16.msra.mxu0 %v177_v13 }
  0x11   :  { %179 = vmatprep.subr.bf16.mxu0 %v219_v3 }
  0x14   :  { %181 = vmatpush3.bf16.msra.mxu0 %v180_v16 }
  0x15   :  { %182 = vmatprep.subr.bf16.mxu0 %v219_v3 }
  0x18   :  { %184 = vmatpush3.bf16.msra.mxu0 %v183_v19 }
  0x19   :  { %185 = vmatprep.subr.bf16.mxu0 %v219_v3 }
  0x1c   :  { %187 = vmatpush3.bf16.msra.mxu0 %v186_v22 }
  0x1d   :  { %188 = vmatprep.subr.bf16.mxu0 %v219_v3 }
  0x20   :  { %190 = vmatpush3.bf16.msra.mxu0 %v189_v25 }
  0x23   :  { %165 = vmatmul.mubr.f32.vlgmr.msra.gmra.mrb[0].mxu0 %v12_v26 }
  0xf6   :  { %v95_v27 = vpop.f32.mrb[0].mxu0 }
  0xf7   :  { %100 = vst.msk [vmem:[#allocation2] sm:$0xf] %vm99_vm1, %v95_v27  ;;  %v166_v28 = vpop.f32.mrb[1].mxu0 }
  0xf8   :  { %206 = shalt.err (!%p203_p4)
}
  0xf9   :  { %s207_s19 = scalar_lea.hbm %s303_s2, 64 }
  0xfa   :  { %p208_p5 = scmp.ne.s32.totalorder %s303_s2, %s207_s19  ;;  %p211_p6 = scmp.lt.u32.totalorder %s207_s19, %s303_s2 }
  0xfc   :  { %p213_p7 = pnand %p211_p6, %p208_p5 }
  0xfe   :  { %216 = shalt.err (!%p213_p7)
}
  0xff   :  { %110 = dma.vmem_to_hbm [thread:$0]  %s108_s16, 64, %s303_s2, [#allocation3]  }
 0x100   :  { %217 = dma.done.wait [#allocation3], 64  }
 0x101   :  { %218 = vsyncadd [#allocation3], 4294967232 }
 0x102   :  { %114 = vsyncpa [#allocation3], 1 }

</bundles_post_ra>
